<compile_context>
chip_gen: v6e
topology: v6e:2x2x1
jax: 0.10.0
libtpu: 0.0.40
codegen_flags: <defaults>
</compile_context>

<pallas_src>
import functools

import jax
import jax.numpy as jnp
from jax import lax
from jax.experimental import pallas as pl
from jax.experimental.pallas import tpu as pltpu


def _spatial_gate_kernel(x_ref, mask_ref, w_ref, bn_ref, o_ref, *, C, H, W):
    HW = H * W
    xf = x_ref[...].astype(jnp.float32)            # (Nb, C, HW), lane-dense
    Nb = xf.shape[0]

    # --- ChannelPool: max and mean over the channel axis ---
    cmax = jnp.max(xf, axis=1)                      # (Nb, HW)
    cmean = jnp.sum(xf, axis=1) * (1.0 / C)         # (Nb, HW)
    pooled = (cmax, cmean)                          # channel 0 = max, channel 1 = mean

    # --- Hoisted scalar / mask reads (one broadcast each, not per tap) ---
    w_vals = [w_ref[i] for i in range(18)]          # conv weights, OIHW-flattened
    bn_scale = bn_ref[0]
    bn_bias = bn_ref[1]
    masks = mask_ref[...]                           # (9, HW) f32 boundary masks

    # --- 3x3 conv (in=2, out=1, pad=1, no bias): rolls + masks, fully unrolled ---
    acc = jnp.zeros((Nb, HW), jnp.float32)
    for ky in range(3):
        dy = ky - 1
        for kx in range(3):
            dx = kx - 1
            k = ky * 3 + kx
            shift = (-(dy * W + dx)) % HW           # tap offset on the flattened map
            is_center = (dy == 0 and dx == 0)
            m = masks[k:k + 1, :]                   # (1, HW), all-ones for center
            for c in range(2):
                tap = pooled[c]
                if shift != 0:
                    tap = pltpu.roll(tap, shift=shift, axis=1)   # XLU, no padded scratch
                if not is_center:
                    tap = tap * m                   # zero out wrapped / out-of-bound taps
                acc = acc + w_vals[c * 9 + k] * tap

    # --- Folded BatchNorm (inference) + sigmoid ---
    out = jax.nn.sigmoid(acc * bn_scale + bn_bias)
    o_ref[...] = out[:, None, :].astype(o_ref.dtype)


def _pick_batch_block(N, per_img_bytes, target_bytes=2 << 20):
    """Images per grid step: large enough to amortize per-step overhead, but keep
    >= 2 grid steps when N >= 2 so both v7x TensorCores get sharded work."""
    cap = max(1, target_bytes // max(per_img_bytes, 1))
    if N >= 2:
        cap = min(cap, N // 2)
    nb = 1
    for d in range(1, N + 1):
        if d <= cap and N % d == 0:
            nb = d
    return nb


def spatial_gate(x, conv_w, bn_gamma, bn_beta, bn_mean, bn_var, eps=1e-5):
    """x: (N, C, H, W); conv_w: (1, 2, 3, 3); BN params: (1,) each. Returns (N, 1, H, W)."""
    N, C, H, W = x.shape
    HW = H * W
    itemsize = jnp.dtype(x.dtype).itemsize

    # Fold BatchNorm (out_channels == 1) into a post-conv affine.
    bn_scale = bn_gamma / jnp.sqrt(bn_var + eps)
    bn_bias = bn_beta - bn_mean * bn_scale
    w_flat = conv_w.reshape(-1).astype(jnp.float32)                       # (18,)
    bn_params = jnp.stack([bn_scale[0], bn_bias[0]]).astype(jnp.float32)  # (2,)

    # Per-tap boundary masks on the flattened H*W axis (1.0 where the 3x3 tap is valid).
    row_idx = jnp.arange(H, dtype=jnp.int32)[:, None]
    col_idx = jnp.arange(W, dtype=jnp.int32)[None, :]
    tap_masks = []
    for ky in range(3):
        dy = ky - 1
        for kx in range(3):
            dx = kx - 1
            rok = (row_idx + dy >= 0) & (row_idx + dy <= H - 1)
            cok = (col_idx + dx >= 0) & (col_idx + dx <= W - 1)
            tap_masks.append((rok & cok).astype(jnp.float32).reshape(HW))
    tap_masks = jnp.stack(tap_masks)                                      # (9, HW)

    # Lane-dense view (free for contiguous NCHW).
    x_flat = x.reshape(N, C, HW)

    nb = _pick_batch_block(N, C * HW * itemsize)
    grid = (N // nb,)

    # VMEM budget: double-buffered in/out blocks + masks + live intermediates + headroom.
    in_block = nb * C * HW * itemsize
    out_block = nb * HW * itemsize
    mask_block = 9 * HW * 4
    live = 16 * nb * HW * 4
    vmem_limit = int(min(max(2 * (in_block + out_block) + mask_block + live + (2 << 20),
                             16 << 20), 64 << 20))

    kernel = functools.partial(_spatial_gate_kernel, C=C, H=H, W=W)

    out = pl.pallas_call(
        kernel,
        out_shape=jax.ShapeDtypeStruct((N, 1, HW), x.dtype),
        grid_spec=pl.GridSpec(
            grid=grid,
            in_specs=[
                pl.BlockSpec((nb, C, HW), lambda n: (n, 0, 0)),           # activations
                pl.BlockSpec((9, HW), lambda n: (0, 0)),                  # tap masks (fetched once)
                pl.BlockSpec(memory_space=pltpu.MemorySpace.SMEM),        # conv weights (18,)
                pl.BlockSpec(memory_space=pltpu.MemorySpace.SMEM),        # folded BN affine (2,)
            ],
            out_specs=pl.BlockSpec((nb, 1, HW), lambda n: (n, 0, 0)),
        ),
        compiler_params=pltpu.CompilerParams(
            dimension_semantics=("parallel",),
            vmem_limit_bytes=vmem_limit),
        # Purely memory-bound op: advertise the true traffic to XLA's scheduler.
        cost_estimate=pl.CostEstimate(
            flops=int(N * HW * (2 * C + 40)),
            transcendentals=int(N * HW),
            bytes_accessed=int((N * C * HW + N * HW + 9 * HW) * itemsize)),
    )(x_flat, tap_masks, w_flat, bn_params)

    return out.reshape(N, 1, H, W)


def spatial_gate_ref(x, conv_w, bn_gamma, bn_beta, bn_mean, bn_var, eps=1e-5):
    """Pure-JAX reference for correctness check."""
    cmax = jnp.max(x, axis=1, keepdims=True)
    cmean = jnp.mean(x, axis=1, keepdims=True)
    comp = jnp.concatenate([cmax, cmean], axis=1)                     # (N, 2, H, W)
    y = lax.conv_general_dilated(
        comp, conv_w, window_strides=(1, 1), padding=((1, 1), (1, 1)),
        dimension_numbers=("NCHW", "OIHW", "NCHW"))
    scale = bn_gamma / jnp.sqrt(bn_var + eps)
    bias = bn_beta - bn_mean * scale
    y = y * scale[None, :, None, None] + bias[None, :, None, None]
    return jax.nn.sigmoid(y)


if __name__ == "__main__":
    key = jax.random.PRNGKey(0)
    kx, kw = jax.random.split(key)

    N, C, H, W = 2, 4, 16, 16
    x = jax.random.normal(kx, (N, C, H, W), dtype=jnp.float32)

    # Conv2d(2, 1, 3, bias=False) weights — deterministic synthetic init.
    conv_w = jax.random.normal(kw, (1, 2, 3, 3), dtype=jnp.float32) * 0.2

    # BatchNorm2d(1) default init / running stats (inference semantics).
    bn_gamma = jnp.ones((1,), jnp.float32)
    bn_beta = jnp.zeros((1,), jnp.float32)
    bn_mean = jnp.zeros((1,), jnp.float32)
    bn_var = jnp.ones((1,), jnp.float32)

    out = spatial_gate(x, conv_w, bn_gamma, bn_beta, bn_mean, bn_var)
    out = jax.block_until_ready(out)

    ref = spatial_gate_ref(x, conv_w, bn_gamma, bn_beta, bn_mean, bn_var)
    assert out.shape == (N, 1, H, W)
    assert jnp.allclose(out, ref, atol=1e-5, rtol=1e-5), "mismatch vs reference"

    print("KERNEL_OK")
</pallas_src>

<mosaic_0001>
module attributes {stable_mosaic.version = 11 : i64} {
  func.func @_spatial_gate_kernel(%arg0: i32, %arg1: memref<1x4x256xf32, #tpu.memory_space<vmem>>, %arg2: memref<9x256xf32, #tpu.memory_space<vmem>>, %arg3: memref<18xf32, #tpu.memory_space<smem>>, %arg4: memref<2xf32, #tpu.memory_space<smem>>, %arg5: memref<1x1x256xf32, #tpu.memory_space<vmem>>) attributes {dimension_semantics = [#tpu.dimension_semantics<parallel>], iteration_bounds = array<i64: 2>, scalar_prefetch = 0 : i64, scratch_operands = 0 : i64, tpu.core_type = #tpu.core_type<tc>, window_params = [{transform_indices = @transform_0, window_bounds = array<i64: 1, 4, 256>}, {pipeline_mode = #tpu.pipeline_mode<synchronous>, transform_indices = @transform_1, window_bounds = array<i64: 9, 256>}, {transform_indices = @transform_2, window_bounds = array<i64: 18>}, {transform_indices = @transform_3, window_bounds = array<i64: 2>}, {transform_indices = @transform_4, window_bounds = array<i64: 1, 1, 256>}]} {
    %c0 = arith.constant 0 : index
    %c0_0 = arith.constant 0 : index
    %c0_1 = arith.constant 0 : index
    %0 = vector.load %arg1[%c0, %c0_0, %c0_1] : memref<1x4x256xf32, #tpu.memory_space<vmem>>, vector<1x4x256xf32>
    %cst = arith.constant dense<0xFF800000> : vector<1x256xf32>
    %1 = vector.multi_reduction <maximumf>, %0, %cst [1] : vector<1x4x256xf32> to vector<1x256xf32>
    %cst_2 = arith.constant dense<0.000000e+00> : vector<1x256xf32>
    %2 = vector.multi_reduction <add>, %0, %cst_2 [1] : vector<1x4x256xf32> to vector<1x256xf32>
    %cst_3 = arith.constant 2.500000e-01 : f32
    %3 = vector.broadcast %cst_3 : f32 to vector<1x256xf32>
    %4 = arith.mulf %2, %3 : vector<1x256xf32>
    %c0_4 = arith.constant 0 : index
    %5 = memref.load %arg3[%c0_4] : memref<18xf32, #tpu.memory_space<smem>>
    %c1 = arith.constant 1 : index
    %6 = memref.load %arg3[%c1] : memref<18xf32, #tpu.memory_space<smem>>
    %c2 = arith.constant 2 : index
    %7 = memref.load %arg3[%c2] : memref<18xf32, #tpu.memory_space<smem>>
    %c3 = arith.constant 3 : index
    %8 = memref.load %arg3[%c3] : memref<18xf32, #tpu.memory_space<smem>>
    %c4 = arith.constant 4 : index
    %9 = memref.load %arg3[%c4] : memref<18xf32, #tpu.memory_space<smem>>
    %c5 = arith.constant 5 : index
    %10 = memref.load %arg3[%c5] : memref<18xf32, #tpu.memory_space<smem>>
    %c6 = arith.constant 6 : index
    %11 = memref.load %arg3[%c6] : memref<18xf32, #tpu.memory_space<smem>>
    %c7 = arith.constant 7 : index
    %12 = memref.load %arg3[%c7] : memref<18xf32, #tpu.memory_space<smem>>
    %c8 = arith.constant 8 : index
    %13 = memref.load %arg3[%c8] : memref<18xf32, #tpu.memory_space<smem>>
    %c9 = arith.constant 9 : index
    %14 = memref.load %arg3[%c9] : memref<18xf32, #tpu.memory_space<smem>>
    %c10 = arith.constant 10 : index
    %15 = memref.load %arg3[%c10] : memref<18xf32, #tpu.memory_space<smem>>
    %c11 = arith.constant 11 : index
    %16 = memref.load %arg3[%c11] : memref<18xf32, #tpu.memory_space<smem>>
    %c12 = arith.constant 12 : index
    %17 = memref.load %arg3[%c12] : memref<18xf32, #tpu.memory_space<smem>>
    %c13 = arith.constant 13 : index
    %18 = memref.load %arg3[%c13] : memref<18xf32, #tpu.memory_space<smem>>
    %c14 = arith.constant 14 : index
    %19 = memref.load %arg3[%c14] : memref<18xf32, #tpu.memory_space<smem>>
    %c15 = arith.constant 15 : index
    %20 = memref.load %arg3[%c15] : memref<18xf32, #tpu.memory_space<smem>>
    %c16 = arith.constant 16 : index
    %21 = memref.load %arg3[%c16] : memref<18xf32, #tpu.memory_space<smem>>
    %c17 = arith.constant 17 : index
    %22 = memref.load %arg3[%c17] : memref<18xf32, #tpu.memory_space<smem>>
    %c0_5 = arith.constant 0 : index
    %23 = memref.load %arg4[%c0_5] : memref<2xf32, #tpu.memory_space<smem>>
    %c1_6 = arith.constant 1 : index
    %24 = memref.load %arg4[%c1_6] : memref<2xf32, #tpu.memory_space<smem>>
    %c0_7 = arith.constant 0 : index
    %c0_8 = arith.constant 0 : index
    %25 = vector.load %arg2[%c0_7, %c0_8] : memref<9x256xf32, #tpu.memory_space<vmem>>, vector<9x256xf32>
    %cst_9 = arith.constant 0.000000e+00 : f32
    %26 = vector.broadcast %cst_9 : f32 to vector<1x256xf32>
    %27 = vector.extract_strided_slice %25 {offsets = [0, 0], sizes = [1, 256], strides = [1, 1]} : vector<9x256xf32> to vector<1x256xf32>
    %c17_i32 = arith.constant 17 : i32
    %28 = tpu.dynamic_rotate %1 by %c17_i32 dim 1 : vector<1x256xf32>, i32 -> vector<1x256xf32>
    %29 = arith.mulf %28, %27 : vector<1x256xf32>
    %30 = vector.broadcast %5 : f32 to vector<1x256xf32>
    %31 = arith.mulf %30, %29 : vector<1x256xf32>
    %32 = arith.addf %26, %31 : vector<1x256xf32>
    %c17_i32_10 = arith.constant 17 : i32
    %33 = tpu.dynamic_rotate %4 by %c17_i32_10 dim 1 : vector<1x256xf32>, i32 -> vector<1x256xf32>
    %34 = arith.mulf %33, %27 : vector<1x256xf32>
    %35 = vector.broadcast %14 : f32 to vector<1x256xf32>
    %36 = arith.mulf %35, %34 : vector<1x256xf32>
    %37 = arith.addf %32, %36 : vector<1x256xf32>
    %38 = vector.extract_strided_slice %25 {offsets = [1, 0], sizes = [1, 256], strides = [1, 1]} : vector<9x256xf32> to vector<1x256xf32>
    %c16_i32 = arith.constant 16 : i32
    %39 = tpu.dynamic_rotate %1 by %c16_i32 dim 1 : vector<1x256xf32>, i32 -> vector<1x256xf32>
    %40 = arith.mulf %39, %38 : vector<1x256xf32>
    %41 = vector.broadcast %6 : f32 to vector<1x256xf32>
    %42 = arith.mulf %41, %40 : vector<1x256xf32>
    %43 = arith.addf %37, %42 : vector<1x256xf32>
    %c16_i32_11 = arith.constant 16 : i32
    %44 = tpu.dynamic_rotate %4 by %c16_i32_11 dim 1 : vector<1x256xf32>, i32 -> vector<1x256xf32>
    %45 = arith.mulf %44, %38 : vector<1x256xf32>
    %46 = vector.broadcast %15 : f32 to vector<1x256xf32>
    %47 = arith.mulf %46, %45 : vector<1x256xf32>
    %48 = arith.addf %43, %47 : vector<1x256xf32>
    %49 = vector.extract_strided_slice %25 {offsets = [2, 0], sizes = [1, 256], strides = [1, 1]} : vector<9x256xf32> to vector<1x256xf32>
    %c15_i32 = arith.constant 15 : i32
    %50 = tpu.dynamic_rotate %1 by %c15_i32 dim 1 : vector<1x256xf32>, i32 -> vector<1x256xf32>
    %51 = arith.mulf %50, %49 : vector<1x256xf32>
    %52 = vector.broadcast %7 : f32 to vector<1x256xf32>
    %53 = arith.mulf %52, %51 : vector<1x256xf32>
    %54 = arith.addf %48, %53 : vector<1x256xf32>
    %c15_i32_12 = arith.constant 15 : i32
    %55 = tpu.dynamic_rotate %4 by %c15_i32_12 dim 1 : vector<1x256xf32>, i32 -> vector<1x256xf32>
    %56 = arith.mulf %55, %49 : vector<1x256xf32>
    %57 = vector.broadcast %16 : f32 to vector<1x256xf32>
    %58 = arith.mulf %57, %56 : vector<1x256xf32>
    %59 = arith.addf %54, %58 : vector<1x256xf32>
    %60 = vector.extract_strided_slice %25 {offsets = [3, 0], sizes = [1, 256], strides = [1, 1]} : vector<9x256xf32> to vector<1x256xf32>
    %c1_i32 = arith.constant 1 : i32
    %61 = tpu.dynamic_rotate %1 by %c1_i32 dim 1 : vector<1x256xf32>, i32 -> vector<1x256xf32>
    %62 = arith.mulf %61, %60 : vector<1x256xf32>
    %63 = vector.broadcast %8 : f32 to vector<1x256xf32>
    %64 = arith.mulf %63, %62 : vector<1x256xf32>
    %65 = arith.addf %59, %64 : vector<1x256xf32>
    %c1_i32_13 = arith.constant 1 : i32
    %66 = tpu.dynamic_rotate %4 by %c1_i32_13 dim 1 : vector<1x256xf32>, i32 -> vector<1x256xf32>
    %67 = arith.mulf %66, %60 : vector<1x256xf32>
    %68 = vector.broadcast %17 : f32 to vector<1x256xf32>
    %69 = arith.mulf %68, %67 : vector<1x256xf32>
    %70 = arith.addf %65, %69 : vector<1x256xf32>
    %71 = vector.broadcast %9 : f32 to vector<1x256xf32>
    %72 = arith.mulf %71, %1 : vector<1x256xf32>
    %73 = arith.addf %70, %72 : vector<1x256xf32>
    %74 = vector.broadcast %18 : f32 to vector<1x256xf32>
    %75 = arith.mulf %74, %4 : vector<1x256xf32>
    %76 = arith.addf %73, %75 : vector<1x256xf32>
    %77 = vector.extract_strided_slice %25 {offsets = [5, 0], sizes = [1, 256], strides = [1, 1]} : vector<9x256xf32> to vector<1x256xf32>
    %c255_i32 = arith.constant 255 : i32
    %78 = tpu.dynamic_rotate %1 by %c255_i32 dim 1 : vector<1x256xf32>, i32 -> vector<1x256xf32>
    %79 = arith.mulf %78, %77 : vector<1x256xf32>
    %80 = vector.broadcast %10 : f32 to vector<1x256xf32>
    %81 = arith.mulf %80, %79 : vector<1x256xf32>
    %82 = arith.addf %76, %81 : vector<1x256xf32>
    %c255_i32_14 = arith.constant 255 : i32
    %83 = tpu.dynamic_rotate %4 by %c255_i32_14 dim 1 : vector<1x256xf32>, i32 -> vector<1x256xf32>
    %84 = arith.mulf %83, %77 : vector<1x256xf32>
    %85 = vector.broadcast %19 : f32 to vector<1x256xf32>
    %86 = arith.mulf %85, %84 : vector<1x256xf32>
    %87 = arith.addf %82, %86 : vector<1x256xf32>
    %88 = vector.extract_strided_slice %25 {offsets = [6, 0], sizes = [1, 256], strides = [1, 1]} : vector<9x256xf32> to vector<1x256xf32>
    %c241_i32 = arith.constant 241 : i32
    %89 = tpu.dynamic_rotate %1 by %c241_i32 dim 1 : vector<1x256xf32>, i32 -> vector<1x256xf32>
    %90 = arith.mulf %89, %88 : vector<1x256xf32>
    %91 = vector.broadcast %11 : f32 to vector<1x256xf32>
    %92 = arith.mulf %91, %90 : vector<1x256xf32>
    %93 = arith.addf %87, %92 : vector<1x256xf32>
    %c241_i32_15 = arith.constant 241 : i32
    %94 = tpu.dynamic_rotate %4 by %c241_i32_15 dim 1 : vector<1x256xf32>, i32 -> vector<1x256xf32>
    %95 = arith.mulf %94, %88 : vector<1x256xf32>
    %96 = vector.broadcast %20 : f32 to vector<1x256xf32>
    %97 = arith.mulf %96, %95 : vector<1x256xf32>
    %98 = arith.addf %93, %97 : vector<1x256xf32>
    %99 = vector.extract_strided_slice %25 {offsets = [7, 0], sizes = [1, 256], strides = [1, 1]} : vector<9x256xf32> to vector<1x256xf32>
    %c240_i32 = arith.constant 240 : i32
    %100 = tpu.dynamic_rotate %1 by %c240_i32 dim 1 : vector<1x256xf32>, i32 -> vector<1x256xf32>
    %101 = arith.mulf %100, %99 : vector<1x256xf32>
    %102 = vector.broadcast %12 : f32 to vector<1x256xf32>
    %103 = arith.mulf %102, %101 : vector<1x256xf32>
    %104 = arith.addf %98, %103 : vector<1x256xf32>
    %c240_i32_16 = arith.constant 240 : i32
    %105 = tpu.dynamic_rotate %4 by %c240_i32_16 dim 1 : vector<1x256xf32>, i32 -> vector<1x256xf32>
    %106 = arith.mulf %105, %99 : vector<1x256xf32>
    %107 = vector.broadcast %21 : f32 to vector<1x256xf32>
    %108 = arith.mulf %107, %106 : vector<1x256xf32>
    %109 = arith.addf %104, %108 : vector<1x256xf32>
    %110 = vector.extract_strided_slice %25 {offsets = [8, 0], sizes = [1, 256], strides = [1, 1]} : vector<9x256xf32> to vector<1x256xf32>
    %c239_i32 = arith.constant 239 : i32
    %111 = tpu.dynamic_rotate %1 by %c239_i32 dim 1 : vector<1x256xf32>, i32 -> vector<1x256xf32>
    %112 = arith.mulf %111, %110 : vector<1x256xf32>
    %113 = vector.broadcast %13 : f32 to vector<1x256xf32>
    %114 = arith.mulf %113, %112 : vector<1x256xf32>
    %115 = arith.addf %109, %114 : vector<1x256xf32>
    %c239_i32_17 = arith.constant 239 : i32
    %116 = tpu.dynamic_rotate %4 by %c239_i32_17 dim 1 : vector<1x256xf32>, i32 -> vector<1x256xf32>
    %117 = arith.mulf %116, %110 : vector<1x256xf32>
    %118 = vector.broadcast %22 : f32 to vector<1x256xf32>
    %119 = arith.mulf %118, %117 : vector<1x256xf32>
    %120 = arith.addf %115, %119 : vector<1x256xf32>
    %121 = vector.broadcast %23 : f32 to vector<1x256xf32>
    %122 = arith.mulf %120, %121 : vector<1x256xf32>
    %123 = vector.broadcast %24 : f32 to vector<1x256xf32>
    %124 = arith.addf %122, %123 : vector<1x256xf32>
    %125 = arith.negf %124 : vector<1x256xf32>
    %126 = math.exp %125 : vector<1x256xf32>
    %cst_18 = arith.constant 1.000000e+00 : f32
    %127 = vector.broadcast %cst_18 : f32 to vector<1x256xf32>
    %128 = arith.addf %127, %126 : vector<1x256xf32>
    %129 = arith.divf %127, %128 : vector<1x256xf32>
    %130 = vector.shape_cast %129 : vector<1x256xf32> to vector<1x1x256xf32>
    %c0_19 = arith.constant 0 : index
    %c0_20 = arith.constant 0 : index
    %c0_21 = arith.constant 0 : index
    %131 = vector.load %arg5[%c0_19, %c0_20, %c0_21] : memref<1x1x256xf32, #tpu.memory_space<vmem>>, vector<1x1x256xf32>
    tpu.vector_store %arg5[%c0_19, %c0_20, %c0_21], %130 {strides = array<i32>} : memref<1x1x256xf32, #tpu.memory_space<vmem>>, vector<1x1x256xf32>,
    return
  }
  func.func @transform_0(%arg0: i32) -> (i32, i32, i32) {
    %c0_i32 = arith.constant 0 : i32
    %c0_i32_0 = arith.constant 0 : i32
    %c0_i32_1 = arith.constant 0 : i32
    return %arg0, %c0_i32, %c0_i32_0 : i32, i32, i32
  }
  func.func @transform_1(%arg0: i32) -> (i32, i32) {
    %c0_i32 = arith.constant 0 : i32
    %c0_i32_0 = arith.constant 0 : i32
    %c0_i32_1 = arith.constant 0 : i32
    return %c0_i32, %c0_i32_0 : i32, i32
  }
  func.func @transform_2(%arg0: i32) -> i32 {
    %c0_i32 = arith.constant 0 : i32
    %c0_i32_0 = arith.constant 0 : i32
    return %c0_i32 : i32
  }
  func.func @transform_3(%arg0: i32) -> i32 {
    %c0_i32 = arith.constant 0 : i32
    %c0_i32_0 = arith.constant 0 : i32
    return %c0_i32 : i32
  }
  func.func @transform_4(%arg0: i32) -> (i32, i32, i32) {
    %c0_i32 = arith.constant 0 : i32
    %c0_i32_0 = arith.constant 0 : i32
    %c0_i32_1 = arith.constant 0 : i32
    return %arg0, %c0_i32, %c0_i32_0 : i32, i32, i32
  }
}

</mosaic_0001>

<bundles_post_ra>
// kernel: tpu_custom_call.1
= control target key start
LH: loop header
LB: loop body
LE: loop exit
PB: predicated region body
PF: predicated region fallthrough
CT: control target
= control target key end

     0   :  { %9 = vsyncpa [#allocation3], 0  ;;  %s1445_s0 = inlined_call_operand.hbm [shape: f32[2,4,256], index: 0, kind: input, shape index: {}]   ;;  %s1446_s1 = inlined_call_operand.hbm [shape: f32[9,256], index: 1, kind: input, shape index: {}]   ;;  %s1447_s2 = inlined_call_operand.vmem [shape: f32[18], index: 2, kind: input, shape index: {}]   ;;  %s1448_s3 = inlined_call_operand.vmem [shape: f32[2], index: 3, kind: input, shape index: {}]   ;;  %s1449_s4 = inlined_call_operand.hbm [shape: f32[2,1,256], index: 4, kind: output, shape index: {}]  }
   0x1   :  { %11 = vsyncpa [#allocation3 + $0x1], 0 }
   0x2   :  { %12 = vsyncpa [#allocation7], 0 }
   0x3   :  { %13 = vsyncpa [#allocation5], 0 }
   0x4   :  { %14 = vsyncpa [#allocation10], 0 }
   0x5   :  { %15 = vsyncpa [#allocation4], 0 }
   0x6   :  { %17 = vsyncpa [#allocation4 + $0x1], 0  ;;  %s1069_s15 = smov 0   ;;  %s1071_s16 = smov 0  }
   0x7   :  { %s1073_s17 = smov 0   ;;  %s1075_s18 = smov 0  }
   0x8 LB: > { %s1090_s19 = sadd.s32 4294967295, %s1026_s18   ;;  %s727_s20 = sadd.s32 4294967294, %s1026_s18   ;;  %s1026_s18 = sphi %s1075_s18, %s1475_s18   ;;  %s1022_s17 = sphi %s1073_s17, %s1474_s17   ;;  %s1018_s16 = sphi %s1071_s16, %s1473_s16   ;;  %s1014_s15 = sphi %s1069_s15, %s1472_s15  }
   0x9   : > { %p43_p0 = scmp.ne.s32.totalorder %s1018_s16, %s1014_s15  ;;  %p1450_p1 = scmp.eq.s32.totalorder %s1090_s19, 0 }
   0xa   : > { %p136_p3 = scmp.eq.s32.totalorder %s727_s20, 1  ;;  %p728_p5 = scmp.ge.s32.totalorder %s1026_s18, 1 }
   0xb   : > { %p1099_p4 = por %p1450_p1, %p43_p0  ;;  %p143_p7 = scmp.lt.s32.totalorder %s1026_s18, 3 }
   0xc   : > { %p1104_p6 = por %p136_p3, %p43_p0  ;;  %s1028_s24 = smov [#allocation6]  }
   0xd   : > { %s1454_s21 = scalar_select %p1099_p4, 1, 0 }
   0xe   : > { %s1455_s22 = scalar_select %p1104_p6, 1, 0 }
   0xf   : > { %p1109_p8 = pnand %p728_p5, %p143_p7  ;;  %s155_s25 = sshll.u32 %s1028_s24, 4  ;;  %s156_s25 = int_to_ptr.vmem [resolvable:$true] %s155_s25 }
  0x10   : > { %s169_s28 = sshll.u32 %s1447_s2, 4  ;;  %s180_s6 = sshll.u32 %s1448_s3, 4  ;;  %s170_s28 = int_to_ptr.vmem [resolvable:$true] %s169_s28  ;;  %s1128_s6 = int_to_ptr.vmem [resolvable:$true] %s180_s6 }
  0x11   : > { %s1456_s23 = scalar_select %p1109_p8, 1, 0 }
  0x12   : > { %p785_p9 = pneg %p1109_p8  ;;  %s877_s7 = scalar_lea.vmem %s156_s25, 512 }
  0x13   : > { %p878_p13 = scmp.ne.s32.totalorder %s156_s25, %s877_s7  ;;  %p885_p5 = scmp.lt.s32.totalorder %s156_s25, %s156_s25 }
  0x14   : > { %p1121_p11 = pnand %p785_p9, %p1450_p1  ;;  %p886_p7 = scmp.lt.s32.totalorder %s877_s7, %s877_s7 }
  0x16   : > { %p868_p12 = pneg %p1121_p11  ;;  %p887_p9 = por %p886_p7, %p885_p5 }
  0x18   : > { %p880_p0 = pnand %p878_p13, %p868_p12 }
  0x1a   : > { %p881_p3 = pneg %p880_p0 }
  0x1c   : > { %p888_p10 = pnand %p887_p9, %p881_p3 }
  0x1e   : > { %891 = shalt.err (!%p888_p10)
}
  0x1f   : > { %s1029_s8 = smov 256   ;;  %s1030_s9 = smov 16  }
  0x20   : > { %788 = dma.hbm_to_vmem [thread:$0]  (!%p1121_p11), %s1446_s1, 512, %s156_s25, [#allocation7], %s1029_s8, %s1029_s8, %s1030_s9  }
  0x21   : > { %s892_s12 = scalar_lea.vmem %s170_s28, 16  ;;  %p900_p2 = scmp.lt.s32.totalorder %s170_s28, %s170_s28 }
  0x22   : > { %p893_p1 = scmp.ne.s32.totalorder %s170_s28, %s892_s12  ;;  %p901_p6 = scmp.lt.s32.totalorder %s892_s12, %s892_s12 }
  0x24   : > { %p895_p13 = pnand %p893_p1, %p868_p12  ;;  %p902_p5 = por %p901_p6, %p900_p2 }
  0x26   : > { %p896_p0 = pneg %p895_p13 }
  0x28   : > { %p903_p3 = pnand %p902_p5, %p896_p0 }
  0x2a   : > { %906 = shalt.err (!%p903_p3)
}
  0x2b   : > { %s1031_s13 = smov [#allocation8]   ;;  %s907_s14 = scalar_lea.vmem %s1128_s6, 16 }
  0x2c   : > { %791 = dma.vmem_to_smem (!%p1121_p11), %s170_s28, 16, %s1031_s13, [#allocation5]  }
  0x2d   : > { %p908_p10 = scmp.ne.s32.totalorder %s1128_s6, %s907_s14  ;;  %p915_p9 = scmp.lt.s32.totalorder %s1128_s6, %s1128_s6 }
  0x2e   : > { %p916_p13 = scmp.lt.s32.totalorder %s907_s14, %s907_s14 }
  0x2f   : > { %p910_p7 = pnand %p908_p10, %p868_p12 }
  0x30   : > { %p917_p2 = por %p916_p13, %p915_p9 }
  0x31   : > { %p911_p1 = pneg %p910_p7 }
  0x33   : > { %p918_p6 = pnand %p917_p2, %p911_p1 }
  0x35   : > { %921 = shalt.err (!%p918_p6)
}
  0x36   : > { %s1032_s20 = smov [#allocation9]   ;;  %s1156_s24 = sadd.s32 1, %s1026_s18  }
  0x37   : > { %794 = dma.vmem_to_smem (!%p1121_p11), %s1128_s6, 16, %s1032_s20, [#allocation10]  }
  0x38   : > { %s27_s25 = ssub.s32 %s1026_s18, %s1156_s24  ;;  %s30_s26 = sadd.s32 1, %s1022_s17 }
  0x39   : > { %p28_p12 = scmp.eq.s32.totalorder %s27_s25, 0  ;;  %p37_p0 = scmp.ne.s32.totalorder %s1022_s17, %s1018_s16 }
  0x3a   : > { %p38_p5 = scmp.eq.s32.totalorder %s1026_s18, 0  ;;  %p806_p3 = scmp.lt.s32.totalorder %s1026_s18, 2 }
  0x3b   : > { %s1166_s27 = scalar_select %p28_p12, %s1022_s17, %s30_s26  }
  0x3c   : > { %p39_p10 = por %p38_p5, %p37_p0  ;;  %p1458_p7 = scmp.eq.s32.totalorder %s1090_s19, 1 }
  0x3d   : > { %s191_s29 = sand.u32 1, %s1022_s17   ;;  %s767_s30 = sshll.u32 %s1026_s18, 7 }
  0x3e   : > { %p1170_p1 = por %p1458_p7, %p37_p0  ;;  %s733_s5 = sshll.u32 %s191_s29, 3 }
  0x3f   : > { %s1179_s8 = scalar_lea.hbm %s1445_s0, %s767_s30  ;;  %s195_s9 = scalar_lea.vmem [#allocation2], %s733_s5 }
  0x40   : > { %s1459_s28 = scalar_select %p1170_p1, 1, 0 }
  0x41   : > { %s203_s10 = sshll.u32 %s195_s9, 4  ;;  %p1181_p11 = pnand %p806_p3, %p39_p10  ;;  %s204_s10 = int_to_ptr.vmem [resolvable:$true] %s203_s10 }
  0x42   : > { %s192_s12 = scalar_lea.sflag [#allocation3], %s191_s29  ;;  %s922_s13 = scalar_lea.hbm %s1179_s8, 128 }
  0x43   : > { %p923_p9 = scmp.ne.s32.totalorder %s1179_s8, %s922_s13  ;;  %p924_p13 = pneg %p1181_p11 }
  0x44   : > { %s927_s25 = scalar_lea.hbm %s1445_s0, 256  ;;  %p928_p12 = scmp.lt.s32.totalorder %s1179_s8, %s1445_s0 }
  0x45   : > { %p925_p2 = pnand %p924_p13, %p923_p9  ;;  %p929_p0 = scmp.lt.s32.totalorder %s927_s25, %s922_s13 }
  0x47   : > { %p926_p6 = pneg %p925_p2  ;;  %p930_p5 = por %p929_p0, %p928_p12 }
  0x49   : > { %p931_p3 = pnand %p930_p5, %p926_p6 }
  0x4b   : > { %934 = shalt.err (!%p931_p3)
}
  0x4c   : > { %s935_s5 = scalar_lea.vmem %s204_s10, 128  ;;  %s1033_s29 = smov [#allocation2]  }
  0x4d   : > { %p936_p10 = scmp.ne.s32.totalorder %s204_s10, %s935_s5  ;;  %s940_s6 = sshll.u32 %s1033_s29, 4  ;;  %s941_s6 = int_to_ptr.vmem [resolvable:$false] %s940_s6 }
  0x4e   : > { %s942_s7 = scalar_lea.vmem %s941_s6, 256  ;;  %p943_p9 = scmp.lt.s32.totalorder %s204_s10, %s941_s6 }
  0x4f   : > { %p938_p7 = pnand %p936_p10, %p924_p13  ;;  %p944_p2 = scmp.lt.s32.totalorder %s942_s7, %s935_s5 }
  0x51   : > { %p939_p1 = pneg %p938_p7  ;;  %p945_p4 = por %p944_p2, %p943_p9 }
  0x53   : > { %p946_p8 = pnand %p945_p4, %p939_p1 }
  0x55   : > { %949 = shalt.err (!%p946_p8)
}
  0x56   : > { %798 = dma.hbm_to_vmem [thread:$0]  (!%p1181_p11), %s1179_s8, 128, %s204_s10, %s192_s12  }
  0x57   : > { %p1461_p6 = scmp.ne.s32.totalorder %s1456_s23, 0 }
  0x58   : > { %s1202_s9 = sand.u32 (!%p1461_p6), 1, %s1018_s16   ;;  %p1462_p13 = scmp.ne.s32.totalorder (!%p1461_p6), %s1454_s21, 0 }
  0x59   : > { %212 = sbr.rel (%p1461_p6) target bundleno = 361 (0x169), region = 36  ;;  %s737_s13 = sshll.u32 (!%p1461_p6), %s1202_s9, 3 }
  0x5a   : > { %s215_s14 = scalar_lea.sflag (!%p1461_p6), [#allocation3], %s1202_s9  ;;  %s218_s20 = scalar_lea.vmem (!%p1461_p6), [#allocation2], %s737_s13 }
  0x5e   : > { %993 = dma.done.wait (%p1462_p13), %s215_s14, 128  }
  0x5f   : > { %995 = vsyncadd (%p1462_p13), %s215_s14, 4294967168  ;;  %p1463_p4 = scmp.eq.s32.totalorder %s1090_s19, 0 }
  0x61   : > { %997 = dma.done.wait (%p1463_p4), [#allocation7], 512   ;;  %p1464_p8 = pmov %p1463_p4 }
  0x62   : > { %p1465_p1 = pmov %p1463_p4 }
  0x63   : > { %999 = vsyncadd (%p1464_p8), [#allocation7], 4294966784 }
  0x64   : > { %1001 = dma.done.wait (%p1465_p1), [#allocation5], 16   ;;  %p1466_p11 = pmov %p1465_p1 }
  0x65   : > { %p1467_p12 = pmov %p1465_p1 }
  0x66   : > { %1003 = vsyncadd (%p1466_p11), [#allocation5], 4294967280 }
  0x67   : > { %1005 = dma.done.wait (%p1467_p12), [#allocation10], 16   ;;  %p1468_p0 = pmov %p1465_p1 }
  0x69   : > { %1007 = vsyncadd (%p1468_p0), [#allocation10], 4294967280 }
  0x6a   : > { %235 = sfence }
  0x6b   : > { %v256_v0 = vld [vmem:[%s218_s20] sm:$0xff]  ;;  %vm260_vm0 = vcmask 1043456   ;;  %s1034_s21 = smov 17   ;;  %s1035_s23 = smov 16   ;;  %v319_v33 = vlaneseq  ;;  %v1271_v38 = vld [vmem:[#allocation6] sm:$0xff]  ;;  %v1273_v39 = vld [vmem:[#allocation6 + $0x8] sm:$0xff] }
  0x6c   : > { %v261_v1 = vsel %vm260_vm0, %v256_v0, -inf  ;;  %v275_v2 = vsel %vm260_vm0, %v256_v0, 0.0  ;;  %v258_v3 = vcombine.high %v256_v0, %v256_v0  ;;  %s1036_s8 = smov 15   ;;  %s1037_s10 = smov 1   ;;  %v353_v42 = vrot.slane %v1271_v38, 1 }
  0x6d   : > { %v262_v4 = vrot.slane %v261_v1, 4  ;;  %v276_v5 = vrot.slane %v275_v2, 4  ;;  %s1038_s11 = smov 127   ;;  %s1039_s12 = smov 113   ;;  %v1263_v36 = vand.u32 127, %v319_v33  ;;  %v354_v43 = vrot.slane %v1273_v39, 1 }
  0x6e   : > { %v268_v6 = vsel %vm260_vm0, %v258_v3, -inf  ;;  %v282_v7 = vsel %vm260_vm0, %v258_v3, 0.0  ;;  %s1040_s25 = smov 112   ;;  %s1041_s26 = smov 111   ;;  %v384_v59 = vrot.slane %v1271_v38, 2  ;;  %v385_v63 = vrot.slane %v1273_v39, 2 }
  0x6f   : > { %v263_v8 = vmax.f32 %v261_v1, %v262_v4  ;;  %v277_v9 = vadd.f32 %v276_v5, %v275_v2  ;;  %v269_v10 = vrot.slane %v268_v6, 4  ;;  %v283_v11 = vrot.slane %v282_v7, 4  ;;  %s1265_s30 = sld [smem:[#allocation8]]  ;;  %p1469_p3 = scmp.ne.s32.totalorder %s1459_s28, 0 }
  0x70   : > { %s1267_s5 = sld [smem:[#allocation8 + $0x9]]  ;;  %vm348_vm1 = vcmp.lt.s32.totalorder %v1263_v36, 16  ;;  %vm321_vm2 = vcmp.lt.s32.totalorder %v1263_v36, 17  ;;  %vm381_vm3 = vcmp.lt.s32.totalorder %v1263_v36, 15  ;;  %vm412_vm4 = vcmp.lt.s32.totalorder %v1263_v36, 1 }
  0x71   : > { %v264_v12 = vrot.slane %v263_v8, 2  ;;  %v278_v13 = vrot.slane %v277_v9, 2  ;;  %v270_v14 = vmax.f32 %v268_v6, %v269_v10  ;;  %v284_v15 = vadd.f32 %v283_v11, %v282_v7  ;;  %s1269_s29 = sld [smem:[#allocation8 + $0x1]] }
  0x72   : > { %s1276_s6 = sld [smem:[#allocation8 + $0xa]]  ;;  %vm453_vm5 = vcmp.lt.s32.totalorder %v1263_v36, 127  ;;  %vm484_vm6 = vcmp.lt.s32.totalorder %v1263_v36, 113  ;;  %vm515_vm7 = vcmp.lt.s32.totalorder %v1263_v36, 112  ;;  %vm546_vm8 = vcmp.lt.s32.totalorder %v1263_v36, 111 }
  0x73   : > { %v265_v16 = vmax.f32 %v263_v8, %v264_v12  ;;  %v279_v17 = vadd.f32 %v278_v13, %v277_v9  ;;  %v271_v18 = vrot.slane %v270_v14, 2  ;;  %v285_v19 = vrot.slane %v284_v15, 2  ;;  %s1285_s7 = sld [smem:[#allocation8 + $0x2]] }
  0x74   : > { %s1310_s13 = sld [smem:[#allocation8 + $0xb]]  ;;  %vm607_vm9 = vcmp.lt.s32.totalorder %v319_v33, 256 }
  0x75   : > { %v266_v20 = vrot.slane %v265_v16, 1  ;;  %v280_v21 = vrot.slane %v279_v17, 1  ;;  %v272_v22 = vmax.f32 %v270_v14, %v271_v18  ;;  %v286_v26 = vadd.f32 %v285_v19, %v284_v15  ;;  %s1312_s14 = sld [smem:[#allocation8 + $0x3]] }
  0x76   : > { %v326_v49 = vstv %s1265_s30  ;;  %v339_v52 = vstv %s1267_s5  ;;  %s1320_s20 = sld [smem:[#allocation8 + $0x4]] }
  0x77   : > { %v1222_v23 = vmax.f32 %v265_v16, %v266_v20  ;;  %v281_v24 = vadd.f32 %v280_v21, %v279_v17  ;;  %v273_v25 = vrot.slane %v272_v22, 1  ;;  %v287_v29 = vrot.slane %v286_v26, 1  ;;  %s1381_s30 = sld [smem:[#allocation8 + $0x8]] }
  0x78   : > { %v359_v58 = vstv %s1269_s29  ;;  %v372_v2 = vstv %s1276_s6  ;;  %s1393_s5 = sld [smem:[#allocation8 + $0x11]] }
  0x79   : > { %315 = vrot.lane.b32.xlu0 %v1222_v23, %s1034_s21  ;;  %v1225_v27 = vmul.f32 0.25, %v281_v24  ;;  %v1228_v28 = vmax.f32 %v272_v22, %v273_v25  ;;  %v288_v30 = vadd.f32 %v287_v29, %v286_v26  ;;  %v390_v17 = vstv %s1285_s7  ;;  %s309_s29 = sld [smem:[#allocation9]]  ;;  %s741_s7 = sshll.u32 %s1202_s9, 1 }
  0x7a   : > { %s759_s6 = sld [smem:[#allocation9 + $0x1]] }
  0x7b   : > { %331 = vrot.lane.b32.xlu1 %v1225_v27, %s1034_s21  ;;  %v1234_v31 = vmul.f32 0.25, %v288_v30  ;;  %v415_v30 = vrot.slane %v1271_v38, 3 }
  0x7d   : > { %344 = vrot.lane.b32.xlu0 %v1222_v23, %s1035_s23 }
  0x7f   : > { %346 = vrot.lane.b32.xlu1 %v1228_v28, %s1035_s23 }
  0x81   : > { %377 = vrot.lane.b32.xlu0 %v1222_v23, %s1036_s8 }
  0x83   : > { %379 = vrot.lane.b32.xlu1 %v1228_v28, %s1036_s8 }
  0x85   : > { %317 = vrot.lane.b32.xlu0 %v1228_v28, %s1034_s21 }
  0x87   : > { %333 = vrot.lane.b32.xlu1 %v1234_v31, %s1034_s21  ;;  %s1328_s21 = sld [smem:[#allocation8 + $0xc]] }
  0x89   : > { %364 = vrot.lane.b32.xlu0 %v1225_v27, %s1035_s23 }
  0x8b   : > { %366 = vrot.lane.b32.xlu1 %v1234_v31, %s1035_s23  ;;  %s1331_s23 = sld [smem:[#allocation8 + $0xd]] }
  0x8d   : > { %395 = vrot.lane.b32.xlu0 %v1225_v27, %s1036_s8 }
  0x8f   : > { %397 = vrot.lane.b32.xlu1 %v1234_v31, %s1036_s8  ;;  %s1349_s8 = sld [smem:[#allocation8 + $0x5]] }
  0x91   : > { %408 = vrot.lane.b32.xlu0 %v1222_v23, %s1037_s10 }
  0x93   : > { %410 = vrot.lane.b32.xlu1 %v1228_v28, %s1037_s10 }
  0x95   : > { %426 = vrot.lane.b32.xlu0 %v1225_v27, %s1037_s10 }
  0x97   : > { %428 = vrot.lane.b32.xlu1 %v1234_v31, %s1037_s10  ;;  %s1352_s10 = sld [smem:[#allocation8 + $0xe]] }
  0x99   : > { %449 = vrot.lane.b32.xlu0 %v1222_v23, %s1038_s11 }
  0x9b   : > { %451 = vrot.lane.b32.xlu1 %v1228_v28, %s1038_s11 }
  0x9d   : > { %467 = vrot.lane.b32.xlu0 %v1225_v27, %s1038_s11 }
  0x9f   : > { %469 = vrot.lane.b32.xlu1 %v1234_v31, %s1038_s11  ;;  %s1354_s11 = sld [smem:[#allocation8 + $0x6]] }
  0xa1   : > { %480 = vrot.lane.b32.xlu0 %v1222_v23, %s1039_s12 }
  0xa3   : > { %482 = vrot.lane.b32.xlu1 %v1228_v28, %s1039_s12 }
  0xa5   : > { %498 = vrot.lane.b32.xlu0 %v1225_v27, %s1039_s12 }
  0xa7   : > { %500 = vrot.lane.b32.xlu1 %v1234_v31, %s1039_s12  ;;  %s1359_s12 = sld [smem:[#allocation8 + $0xf]] }
  0xa9   : > { %511 = vrot.lane.b32.xlu0 %v1222_v23, %s1040_s25 }
  0xab   : > { %513 = vrot.lane.b32.xlu1 %v1228_v28, %s1040_s25 }
  0xad   : > { %529 = vrot.lane.b32.xlu0 %v1225_v27, %s1040_s25 }
  0xaf   : > { %531 = vrot.lane.b32.xlu1 %v1234_v31, %s1040_s25  ;;  %s1364_s25 = sld [smem:[#allocation8 + $0x7]] }
  0xb1   : > { %542 = vrot.lane.b32.xlu0 %v1222_v23, %s1041_s26 }
  0xb3   : > { %544 = vrot.lane.b32.xlu1 %v1228_v28, %s1041_s26 }
  0xb5   : > { %556 = vrot.lane.b32.xlu0 %v1225_v27, %s1041_s26 }
  0xb7   : > { %558 = vrot.lane.b32.xlu1 %v1234_v31, %s1041_s26  ;;  %s1379_s26 = sld [smem:[#allocation8 + $0x10]] }
  0xeb   : > { %v316_v32 = vpop.permute.xlu0 %315 }
  0xed   : > { %v332_v34 = vpop.permute.xlu1 %331 }
  0xef   : > { %v345_v35 = vpop.permute.xlu0 %344 }
  0xf1   : > { %v347_v37 = vpop.permute.xlu1 %346 }
  0xf2   : > { %v349_v44 = vsel %vm348_vm1, %v345_v35, %v347_v37  ;;  %v350_v45 = vsel %vm348_vm1, %v347_v37, %v345_v35 }
  0xf3   : > { %v378_v40 = vpop.permute.xlu0 %377  ;;  %v357_v54 = vmul.f32 %v353_v42, %v350_v45  ;;  %v358_v55 = vmul.f32 %v354_v43, %v349_v44  ;;  %v403_v44 = vstv %s1310_s13  ;;  %s768_s13 = sshll.u32 %s1090_s19, 5 }
  0xf5   : > { %v380_v41 = vpop.permute.xlu1 %379  ;;  %v360_v8 = vmul.f32 %v359_v58, %v357_v54  ;;  %v361_v9 = vmul.f32 %v359_v58, %v358_v55 }
  0xf6   : > { %v382_v0 = vsel %vm381_vm3, %v378_v40, %v380_v41  ;;  %v383_v1 = vsel %vm381_vm3, %v380_v41, %v378_v40 }
  0xf7   : > { %v318_v46 = vpop.permute.xlu0 %317  ;;  %v388_v18 = vmul.f32 %v384_v59, %v383_v1  ;;  %v389_v19 = vmul.f32 %v385_v63, %v382_v0 }
  0xf8   : > { %v322_v47 = vsel %vm321_vm2, %v316_v32, %v318_v46  ;;  %v323_v48 = vsel %vm321_vm2, %v318_v46, %v316_v32  ;;  %v416_v32 = vrot.slane %v1273_v39, 3  ;;  %v421_v46 = vstv %s1312_s14  ;;  %s255_s14 = scalar_lea.vmem [#allocation11], %s741_s7 }
  0xf9   : > { %v324_v50 = vmul.f32 %v323_v48, %v1271_v38  ;;  %v325_v51 = vmul.f32 %v322_v47, %v1273_v39  ;;  %v334_v53 = vpop.permute.xlu1 %333 }
  0xfa   : > { %v335_v56 = vsel %vm321_vm2, %v332_v34, %v334_v53  ;;  %v336_v57 = vsel %vm321_vm2, %v334_v53, %v332_v34 }
  0xfb   : > { %v337_v60 = vmul.f32 %v336_v57, %v1271_v38  ;;  %v338_v61 = vmul.f32 %v335_v56, %v1273_v39  ;;  %v365_v62 = vpop.permute.xlu0 %364  ;;  %v327_v3 = vmul.f32 %v326_v49, %v324_v50  ;;  %v328_v4 = vmul.f32 %v326_v49, %v325_v51 }
  0xfd   : > { %v340_v5 = vmul.f32 %v339_v52, %v337_v60  ;;  %v341_v6 = vmul.f32 %v339_v52, %v338_v61  ;;  %v367_v7 = vpop.permute.xlu1 %366  ;;  %v434_v60 = vstv %s1328_s21 }
  0xfe   : > { %v368_v10 = vsel %vm348_vm1, %v365_v62, %v367_v7  ;;  %v369_v11 = vsel %vm348_vm1, %v367_v7, %v365_v62 }
  0xff   : > { %v342_v12 = vadd.f32 %v340_v5, %v327_v3  ;;  %v343_v13 = vadd.f32 %v341_v6, %v328_v4  ;;  %v370_v14 = vmul.f32 %v369_v11, %v353_v42  ;;  %v371_v15 = vmul.f32 %v368_v10, %v354_v43  ;;  %v396_v16 = vpop.permute.xlu0 %395 }
 0x100   : > { %v391_v42 = vmul.f32 %v390_v17, %v388_v18  ;;  %v392_v43 = vmul.f32 %v390_v17, %v389_v19  ;;  %v444_v6 = vstv %s1331_s23  ;;  %v456_v19 = vrot.slane %v1271_v38, 5 }
 0x101   : > { %v362_v20 = vadd.f32 %v360_v8, %v342_v12  ;;  %v363_v21 = vadd.f32 %v361_v9, %v343_v13  ;;  %v373_v22 = vmul.f32 %v372_v2, %v370_v14  ;;  %v374_v24 = vmul.f32 %v372_v2, %v371_v15  ;;  %v398_v25 = vpop.permute.xlu1 %397 }
 0x102   : > { %v399_v26 = vsel %vm381_vm3, %v396_v16, %v398_v25  ;;  %v400_v29 = vsel %vm381_vm3, %v398_v25, %v396_v16  ;;  %v445_v14 = vmul.f32 %v444_v6, %v1225_v27  ;;  %v446_v15 = vmul.f32 %v444_v6, %v1234_v31 }
 0x103   : > { %v375_v34 = vadd.f32 %v373_v22, %v362_v20  ;;  %v376_v35 = vadd.f32 %v374_v24, %v363_v21  ;;  %v401_v37 = vmul.f32 %v400_v29, %v384_v59  ;;  %v402_v40 = vmul.f32 %v399_v26, %v385_v63  ;;  %v409_v41 = vpop.permute.xlu0 %408 }
 0x104   : > { %v439_v59 = vstv %s1320_s20  ;;  %v457_v27 = vrot.slane %v1273_v39, 5  ;;  %s625_s20 = sshll.u32 %s255_s14, 4  ;;  %s626_s20 = int_to_ptr.vmem [resolvable:$true] %s625_s20 }
 0x105   : > { %v411_v45 = vpop.permute.xlu1 %410  ;;  %v393_v47 = vadd.f32 %v391_v42, %v375_v34  ;;  %v394_v48 = vadd.f32 %v392_v43, %v376_v35  ;;  %v404_v51 = vmul.f32 %v403_v44, %v401_v37  ;;  %v405_v52 = vmul.f32 %v403_v44, %v402_v40 }
 0x106   : > { %v413_v49 = vsel %vm412_vm4, %v409_v41, %v411_v45  ;;  %v414_v50 = vsel %vm412_vm4, %v411_v45, %v409_v41  ;;  %v440_v4 = vmul.f32 %v439_v59, %v1222_v23  ;;  %v441_v5 = vmul.f32 %v439_v59, %v1228_v28 }
 0x107   : > { %v419_v53 = vmul.f32 %v415_v30, %v414_v50  ;;  %v420_v54 = vmul.f32 %v416_v32, %v413_v49  ;;  %v427_v55 = vpop.permute.xlu0 %426  ;;  %v406_v63 = vadd.f32 %v404_v51, %v393_v47  ;;  %v407_v0 = vadd.f32 %v405_v52, %v394_v48 }
 0x108   : > { %v462_v34 = vstv %s1349_s8  ;;  %v487_v35 = vrot.slane %v1271_v38, 6  ;;  %v488_v37 = vrot.slane %v1273_v39, 6  ;;  %v475_v45 = vstv %s1352_s10  ;;  %s623_s8 = scalar_lea.hbm %s1449_s4, %s768_s13  ;;  %s611_s10 = scalar_lea.sflag [#allocation4], %s1202_s9 }
 0x109   : > { %v422_v56 = vmul.f32 %v421_v46, %v419_v53  ;;  %v423_v57 = vmul.f32 %v421_v46, %v420_v54  ;;  %v429_v58 = vpop.permute.xlu1 %428  ;;  %v493_v46 = vstv %s1354_s11  ;;  %v518_v54 = vrot.slane %v1271_v38, 7  ;;  %s950_s11 = scalar_lea.vmem %s626_s20, 32 }
 0x10a   : > { %v430_v61 = vsel %vm412_vm4, %v427_v55, %v429_v58  ;;  %v431_v62 = vsel %vm412_vm4, %v429_v58, %v427_v55  ;;  %v519_v55 = vrot.slane %v1273_v39, 7  ;;  %p951_p5 = scmp.ne.s32.totalorder %s626_s20, %s950_s11 }
 0x10b   : > { %v432_v1 = vmul.f32 %v431_v62, %v415_v30  ;;  %v433_v2 = vmul.f32 %v430_v61, %v416_v32  ;;  %v450_v3 = vpop.permute.xlu0 %449  ;;  %v424_v7 = vadd.f32 %v422_v56, %v406_v63  ;;  %v425_v8 = vadd.f32 %v423_v57, %v407_v0 }
 0x10c   : > { %v506_v0 = vstv %s1359_s12  ;;  %p952_p10 = pnand %p951_p5, %p1469_p3  ;;  %s1043_s12 = smov [#allocation11]  }
 0x10d   : > { %v435_v9 = vmul.f32 %v434_v60, %v432_v1  ;;  %v436_v10 = vmul.f32 %v434_v60, %v433_v2  ;;  %v452_v11 = vpop.permute.xlu1 %451  ;;  %s954_s19 = sshll.u32 %s1043_s12, 4  ;;  %s955_s19 = int_to_ptr.vmem [resolvable:$false] %s954_s19 }
 0x10e   : > { %v454_v21 = vsel %vm453_vm5, %v450_v3, %v452_v11  ;;  %v455_v22 = vsel %vm453_vm5, %v452_v11, %v450_v3  ;;  %v524_v3 = vstv %s1364_s25  ;;  %p953_p7 = pneg %p952_p10  ;;  %s956_s25 = scalar_lea.vmem %s955_s19, 64 }
 0x10f   : > { %v437_v12 = vadd.f32 %v435_v9, %v424_v7  ;;  %v438_v13 = vadd.f32 %v436_v10, %v425_v8  ;;  %v468_v16 = vpop.permute.xlu0 %467  ;;  %v460_v29 = vmul.f32 %v456_v19, %v454_v21  ;;  %v461_v30 = vmul.f32 %v457_v27, %v455_v22  ;;  %p957_p9 = scmp.lt.s32.totalorder %s626_s20, %s955_s19  ;;  %p958_p2 = scmp.lt.s32.totalorder %s956_s25, %s950_s11 }
 0x111   : > { %v442_v17 = vadd.f32 %v440_v4, %v437_v12  ;;  %v443_v18 = vadd.f32 %v441_v5, %v438_v13  ;;  %v470_v23 = vpop.permute.xlu1 %469  ;;  %v463_v47 = vmul.f32 %v462_v34, %v460_v29  ;;  %v464_v48 = vmul.f32 %v462_v34, %v461_v30  ;;  %p959_p6 = por %p958_p2, %p957_p9 }
 0x112   : > { %v471_v25 = vsel %vm453_vm5, %v468_v16, %v470_v23  ;;  %v472_v26 = vsel %vm453_vm5, %v470_v23, %v468_v16  ;;  %v313_v23 = vld [vmem:[#allocation6 + $0x10] sm:$0x1] }
 0x113   : > { %v447_v28 = vadd.f32 %v445_v14, %v442_v17  ;;  %v448_v20 = vadd.f32 %v446_v15, %v443_v18  ;;  %v481_v31 = vpop.permute.xlu0 %480  ;;  %v473_v40 = vmul.f32 %v471_v25, %v456_v19  ;;  %v474_v41 = vmul.f32 %v472_v26, %v457_v27  ;;  %p960_p13 = pnand %p959_p6, %p953_p7 }
 0x114   : > { %v537_v18 = vstv %s1379_s26 }
 0x115   : > { %v483_v24 = vpop.permute.xlu1 %482  ;;  %v465_v56 = vadd.f32 %v463_v47, %v447_v28  ;;  %v466_v57 = vadd.f32 %v464_v48, %v448_v20  ;;  %v476_v58 = vmul.f32 %v475_v45, %v473_v40  ;;  %v477_v59 = vmul.f32 %v475_v45, %v474_v41  ;;  %v314_v28 = vld [vmem:[#allocation6 + $0x18] sm:$0x1] }
 0x116   : > { %v485_v42 = vsel %vm484_vm6, %v481_v31, %v483_v24  ;;  %v486_v43 = vsel %vm484_vm6, %v483_v24, %v481_v31  ;;  %v551_v31 = vstv %s1381_s30 }
 0x117   : > { %v499_v32 = vpop.permute.xlu0 %498  ;;  %v491_v52 = vmul.f32 %v487_v35, %v485_v42  ;;  %v492_v53 = vmul.f32 %v488_v37, %v486_v43  ;;  %v478_v4 = vadd.f32 %v476_v58, %v465_v56  ;;  %v479_v5 = vadd.f32 %v477_v59, %v466_v57 }
 0x118   : > { %v564_v43 = vstv %s1393_s5  ;;  %v572_v57 = vstv %s759_s6 }
 0x119   : > { %v501_v44 = vpop.permute.xlu1 %500  ;;  %v494_v1 = vmul.f32 %v493_v46, %v491_v52  ;;  %v495_v2 = vmul.f32 %v493_v46, %v492_v53 }
 0x11a   : > { %v502_v49 = vsel %vm484_vm6, %v499_v32, %v501_v44  ;;  %v503_v50 = vsel %vm484_vm6, %v501_v44, %v499_v32 }
 0x11b   : > { %v512_v51 = vpop.permute.xlu0 %511  ;;  %v504_v61 = vmul.f32 %v502_v49, %v487_v35  ;;  %v505_v62 = vmul.f32 %v503_v50, %v488_v37  ;;  %v496_v16 = vadd.f32 %v494_v1, %v478_v4  ;;  %v497_v17 = vadd.f32 %v495_v2, %v479_v5 }
 0x11c   : > { %v1042_v1 = vmov 1966171168   ;;  %v594_v4 = vshrl.u32 %v319_v33, 7 }
 0x11d   : > { %v514_v60 = vpop.permute.xlu1 %513  ;;  %v507_v9 = vmul.f32 %v506_v0, %v504_v61  ;;  %v508_v10 = vmul.f32 %v506_v0, %v505_v62  ;;  %v591_v2 = vunpack.c.l.s4 %v1042_v1 }
 0x11e   : > { %v516_v63 = vsel %vm515_vm7, %v512_v51, %v514_v60  ;;  %v517_v38 = vsel %vm515_vm7, %v514_v60, %v512_v51 }
 0x11f   : > { %v530_v39 = vpop.permute.xlu0 %529  ;;  %v522_v6 = vmul.f32 %v518_v54, %v516_v63  ;;  %v523_v7 = vmul.f32 %v519_v55, %v517_v38  ;;  %v509_v21 = vadd.f32 %v507_v9, %v496_v16  ;;  %v510_v22 = vadd.f32 %v508_v10, %v497_v17 }
 0x121   : > { %v532_v8 = vpop.permute.xlu1 %531  ;;  %v525_v19 = vmul.f32 %v524_v3, %v522_v6  ;;  %v526_v27 = vmul.f32 %v524_v3, %v523_v7  ;;  %v592_v3 = vunpack.c.0.s8 %v591_v2 }
 0x122   : > { %v533_v11 = vsel %vm515_vm7, %v530_v39, %v532_v8  ;;  %v534_v12 = vsel %vm515_vm7, %v532_v8, %v530_v39 }
 0x123   : > { %v535_v13 = vmul.f32 %v533_v11, %v518_v54  ;;  %v536_v14 = vmul.f32 %v534_v12, %v519_v55  ;;  %v543_v15 = vpop.permute.xlu0 %542  ;;  %v527_v35 = vadd.f32 %v525_v19, %v509_v21  ;;  %v528_v37 = vadd.f32 %v526_v27, %v510_v22 }
 0x124   : > { %v569_v54 = vstv %s309_s29  ;;  %v595_v6 = vsub.s32 %v592_v3, %v594_v4 }
 0x125   : > { %v545_v20 = vpop.permute.xlu1 %544  ;;  %v538_v26 = vmul.f32 %v537_v18, %v535_v13  ;;  %v539_v29 = vmul.f32 %v537_v18, %v536_v14 }
 0x126   : > { %v547_v24 = vsel %vm546_vm8, %v543_v15, %v545_v20  ;;  %v548_v25 = vsel %vm546_vm8, %v545_v20, %v543_v15 }
 0x127   : > { %v549_v30 = vmul.f32 %v547_v24, %v313_v23  ;;  %v550_v32 = vmul.f32 %v548_v25, %v314_v28  ;;  %v557_v34 = vpop.permute.xlu0 %556  ;;  %v540_v46 = vadd.f32 %v538_v26, %v527_v35  ;;  %v541_v47 = vadd.f32 %v539_v29, %v528_v37 }
 0x129   : > { %v552_v40 = vmul.f32 %v551_v31, %v549_v30  ;;  %v553_v41 = vmul.f32 %v551_v31, %v550_v32  ;;  %v559_v42 = vpop.permute.xlu1 %558 }
 0x12a   : > { %v560_v44 = vsel %vm546_vm8, %v557_v34, %v559_v42  ;;  %v561_v45 = vsel %vm546_vm8, %v559_v42, %v557_v34 }
 0x12b   : > { %v562_v48 = vmul.f32 %v560_v44, %v313_v23  ;;  %v563_v49 = vmul.f32 %v561_v45, %v314_v28  ;;  %v554_v50 = vadd.f32 %v552_v40, %v540_v46  ;;  %v555_v51 = vadd.f32 %v553_v41, %v541_v47 }
 0x12d   : > { %v565_v52 = vmul.f32 %v564_v43, %v562_v48  ;;  %v566_v53 = vmul.f32 %v564_v43, %v563_v49 }
 0x12f   : > { %v567_v55 = vadd.f32 %v565_v52, %v554_v50  ;;  %v568_v56 = vadd.f32 %v566_v53, %v555_v51 }
 0x131   : > { %v570_v58 = vmul.f32 %v569_v54, %v567_v55  ;;  %v571_v59 = vmul.f32 %v569_v54, %v568_v56 }
 0x133   : > { %v573_v60 = vadd.f32 %v572_v57, %v570_v58  ;;  %v574_v61 = vadd.f32 %v572_v57, %v571_v59 }
 0x135   : > { %v760_v62 = vmul.f32 -1.442695, %v573_v60  ;;  %v761_v36 = vmul.f32 -1.442695, %v574_v61 }
 0x137   : > { %858 = vpow2.f32 %v760_v62 }
 0x138   : > { %860 = vpow2.f32 %v761_v36 }
 0x144   : > { %v859_v63 = vpop.eup %858 }
 0x145   : > { %v861_v38 = vpop.eup %860  ;;  %v581_v0 = vadd.f32 1.0, %v859_v63 }
 0x146   : > { %v582_v39 = vadd.f32 1.0, %v861_v38 }
 0x147   : > { %862 = vrcp.f32 %v581_v0 }
 0x148   : > { %864 = vrcp.f32 %v582_v39 }
 0x154   : > { %v863_v5 = vpop.eup %862 }
 0x155   : > { %v865_v7 = vpop.eup %864 }
 0x156   : > { %v589_v8 = vcombine.low %v863_v5, %v865_v7 }
 0x158   : > { %v596_v9 = vrot.slane %v589_v8, %v595_v6 }
 0x15a   : > { %v603_v10 = vrot.slane %v596_v9, %v595_v6 }
 0x15c   : > { %609 = vst.msk [vmem:[%s255_s14] sm:$0x3] %vm607_vm9, %v603_v10 }
 0x15d   : > { %963 = shalt.err (!%p960_p13)
}
 0x15e   : > { %s964_s26 = scalar_lea.hbm %s623_s8, 32  ;;  %s968_s5 = scalar_lea.hbm %s1449_s4, 64 }
 0x15f   : > { %p965_p4 = scmp.ne.s32.totalorder %s623_s8, %s964_s26  ;;  %p969_p11 = scmp.lt.s32.totalorder %s623_s8, %s1449_s4 }
 0x160   : > { %p970_p12 = scmp.lt.s32.totalorder %s968_s5, %s964_s26 }
 0x161   : > { %p966_p8 = pnand %p965_p4, %p1469_p3 }
 0x162   : > { %p971_p0 = por %p970_p12, %p969_p11 }
 0x163   : > { %p967_p1 = pneg %p966_p8 }
 0x165   : > { %p972_p5 = pnand %p971_p0, %p967_p1 }
 0x167   : > { %975 = shalt.err (!%p972_p5)
}
 0x168   : > { %783 = dma.vmem_to_hbm [thread:$0]  (%p1469_p3), %s626_s20, 32, %s623_s8, %s611_s10  }
 0x169 PF: > { %s637_s7 = sand.u32 1, %s1014_s15   ;;  %p1470_p10 = scmp.ne.s32.totalorder %s1455_s22, 0 }
 0x16a   : > { %p1471_p7 = scmp.ge.s32.totalorder %s1026_s18, 2  ;;  %s638_s13 = scalar_lea.sflag [#allocation4], %s637_s7 }
 0x16c   : > { %p800_p9 = pnand %p1471_p7, %p1470_p10 }
 0x16e   : > { %p801_p2 = pneg %p800_p9 }
 0x170   : > { %1009 = dma.done.wait (%p801_p2), %s638_s13, 32  }
 0x171   : > { %1011 = vsyncadd (%p801_p2), %s638_s13, 4294967264  ;;  %p20_p6 = scmp.ge.s32.totalorder %s1156_s24, 4   ;;  %s1472_s15 = smov %s1018_s16 }
 0x172   : > { %s1473_s16 = smov %s1022_s17  ;;  %s1474_s17 = smov %s1166_s27 }
 0x173   : > { %s1475_s18 = smov %s1156_s24  ;;  %22 = sbr.rel (!%p20_p6) target bundleno = 8 (0x8), region = 94 }
 0x178   :  { %643 = vsyncpa [#allocation3], 1 }
 0x179   :  { %645 = vsyncpa [#allocation3 + $0x1], 1 }
 0x17a   :  { %646 = vsyncpa [#allocation7], 1 }
 0x17b   :  { %647 = vsyncpa [#allocation4], 1 }
 0x17c   :  { %649 = vsyncpa [#allocation4 + $0x1], 1 }
 0x17d   :  { %650 = vsyncpa [#allocation5], 1 }
 0x17e   :  { %652 = vsyncpa [#allocation5 + $0x1], 1 }
 0x17f   :  { %653 = vsyncpa [#allocation10], 1 }

</bundles_post_ra>
